<compile_context>
chip_gen: v5e
topology: v5e:2x2
jax: 0.10.0
libtpu: 0.0.40
codegen_flags: <defaults>
</compile_context>

<pallas_src>
import functools

import jax
import jax.numpy as jnp
from jax.experimental import pallas as pl
from jax.experimental.pallas import tpu as pltpu


def _round_up(v: int, m: int) -> int:
    return (v + m - 1) // m * m


def _conv2d_kernel(x_ref, cc_ref, rm_ref, out_ref, *, W, KH, KW, Lp):
    # x_ref  : (TB, Lp) f32 VMEM — TB images, each row-major flattened (lane-dense)
    # cc_ref : (KH*KW, Lp) f32 VMEM — filter coeff * column-validity mask per tap
    # rm_ref : (KH, Lp) f32 VMEM — row-validity masks (also kill wrapped lanes)
    # out_ref: (TB, Lp) f32 VMEM
    xv = x_ref[...]

    # Column-shifted copies of the input, shared across all tap rows:
    # only KW-1 lane rotates instead of KH*KW-1 per-tap rotates.
    shifted = [xv]
    for kw in range(1, KW):
        shifted.append(pltpu.roll(xv, (-kw) % Lp, 1))

    acc = None
    for kh in range(KH):
        # Horizontal (within-row) partial sum for tap row kh.  The coefficient
        # table already folds filter value * column mask, so taps that run off
        # the right edge (and lanes the column rotate wrapped) contribute 0.
        s = shifted[0] * cc_ref[pl.ds(kh * KW, 1), :]
        for kw in range(1, KW):
            s = s + shifted[kw] * cc_ref[pl.ds(kh * KW + kw, 1), :]
        if kh == 0:
            acc = s                                       # no row shift, mask all-ones
        else:
            s = pltpu.roll(s, (-(kh * W)) % Lp, 1)        # shift down by kh rows
            acc = acc + s * rm_ref[pl.ds(kh, 1), :]       # kill bottom-edge / wrapped rows

    out_ref[...] = acc


def conv2d(x: jax.Array, k: jax.Array, *, block_n: int | None = None) -> jax.Array:
    """x: (N, H, W) f32, k: (KH, KW) f32 -> (N, H, W) f32 (same semantics as the Triton kernel)."""
    assert x.dtype == jnp.float32 and k.dtype == jnp.float32
    N, H, W = x.shape
    KH, KW = k.shape
    L = H * W
    Lp = _round_up(L, 128)  # lane-dense stores / cheap rolls need a %128 lane dim

    xf = x.reshape(N, L)    # free reshape: HxW plane on the lane axis
    if Lp != L:
        xf = jnp.pad(xf, ((0, 0), (0, Lp - L)))

    lanes = jnp.arange(Lp, dtype=jnp.int32)
    in_plane = lanes < L
    ow = lanes % W
    oh = lanes // W

    # (KH*KW, Lp): filter coefficient pre-multiplied by the column-validity mask
    # ([ow + kw < W]); zero in the lane-padding region.  Tiny one-time XLA op,
    # amortized over every grid step.
    coeffs = jnp.stack(
        [((ow + kw < W) & in_plane).astype(jnp.float32) * k[kh, kw]
         for kh in range(KH) for kw in range(KW)], axis=0)

    # (KH, Lp): row-validity masks ([oh + kh < H]); also zero the lanes that the
    # row rotate wrapped past the end of the plane, and the lane padding.
    row_masks = jnp.stack(
        [((oh + kh < H) & in_plane).astype(jnp.float32) for kh in range(KH)], axis=0)

    if block_n is None:
        # ~2 MiB of f32 input per grid step (amortizes ~0.35us/step overhead even
        # at v7x HBM bandwidth), but force >= 2 grid steps whenever the batch
        # allows it so the "parallel" axis shards across both v7x TensorCores.
        tile_rows = max(8, ((2 << 20) // (4 * Lp)) // 8 * 8)
        half = _round_up(max(pl.cdiv(N, 2), 1), 8)
        block_n = min(tile_rows, half)

    TB = min(block_n, N)
    if TB < N:
        TB = max(8, TB // 8 * 8)  # multi-block tiles must be sublane-aligned

    kernel = functools.partial(_conv2d_kernel, W=W, KH=KH, KW=KW, Lp=Lp)

    out_flat = pl.pallas_call(
        kernel,
        out_shape=jax.ShapeDtypeStruct((N, Lp), jnp.float32),
        grid_spec=pltpu.PrefetchScalarGridSpec(
            num_scalar_prefetch=0,
            grid=(pl.cdiv(N, TB),),                           # batch-blocked grid
            in_specs=[
                pl.BlockSpec((TB, Lp), lambda b: (b, 0)),     # images
                pl.BlockSpec((KH * KW, Lp), lambda b: (0, 0)),  # coeff*col-mask table
                pl.BlockSpec((KH, Lp), lambda b: (0, 0)),     # row masks
            ],
            out_specs=pl.BlockSpec((TB, Lp), lambda b: (b, 0)),
        ),
        compiler_params=pltpu.CompilerParams(
            dimension_semantics=("parallel",),
            vmem_limit_bytes=48 << 20,   # above 16/32 MiB scoped defaults, under v7x 64 MiB physical
        ),
    )(xf, coeffs, row_masks)

    out = out_flat[:, :L] if Lp != L else out_flat
    return out.reshape(N, H, W)


def _conv2d_ref(x, k):
    N, H, W = x.shape
    KH, KW = k.shape
    xp = jnp.pad(x, ((0, 0), (0, KH - 1), (0, KW - 1)))
    out = jnp.zeros_like(x)
    for kh in range(KH):
        for kw in range(KW):
            out = out + xp[:, kh:kh + H, kw:kw + W] * k[kh, kw]
    return out


if __name__ == "__main__":
    key = jax.random.PRNGKey(0)
    kx, kk, kx2, kx3, kx4 = jax.random.split(key, 5)

    KH, KW = 3, 3
    k = jax.random.normal(kk, (KH, KW), dtype=jnp.float32)

    # 1) Small batch of single-channel 16x16 images (single grid step, TB == N).
    x = jax.random.normal(kx, (4, 16, 16), dtype=jnp.float32)
    out = conv2d(x, k)
    jax.block_until_ready(out)
    assert out.shape == x.shape and out.dtype == jnp.float32
    assert jnp.allclose(out, _conv2d_ref(x, k), atol=1e-5, rtol=1e-5), "mismatch (small batch)"

    # 2) Default blocking yields >= 2 grid steps (megacore split path).
    x2 = jax.random.normal(kx2, (256, 16, 16), dtype=jnp.float32)
    out2 = conv2d(x2, k)
    jax.block_until_ready(out2)
    assert jnp.allclose(out2, _conv2d_ref(x2, k), atol=1e-5, rtol=1e-5), "mismatch (multi-step grid)"

    # 3) N not divisible by the block size (partial last block).
    x3 = jax.random.normal(kx3, (100, 16, 16), dtype=jnp.float32)
    out3 = conv2d(x3, k, block_n=32)
    jax.block_until_ready(out3)
    assert jnp.allclose(out3, _conv2d_ref(x3, k), atol=1e-5, rtol=1e-5), "mismatch (partial block)"

    # 4) H*W not a multiple of 128 (lane-padding path).
    x4 = jax.random.normal(kx4, (64, 10, 10), dtype=jnp.float32)
    out4 = conv2d(x4, k)
    jax.block_until_ready(out4)
    assert jnp.allclose(out4, _conv2d_ref(x4, k), atol=1e-5, rtol=1e-5), "mismatch (lane padding)"

    print("KERNEL_OK")
</pallas_src>

<mosaic_0001>
module attributes {stable_mosaic.version = 11 : i64} {
  func.func @_conv2d_kernel(%arg0: i32, %arg1: memref<4x256xf32, #tpu.memory_space<vmem>>, %arg2: memref<9x256xf32, #tpu.memory_space<vmem>>, %arg3: memref<3x256xf32, #tpu.memory_space<vmem>>, %arg4: memref<4x256xf32, #tpu.memory_space<vmem>>) attributes {dimension_semantics = [#tpu.dimension_semantics<parallel>], iteration_bounds = array<i64: 1>, scalar_prefetch = 0 : i64, scratch_operands = 0 : i64, tpu.core_type = #tpu.core_type<tc>, window_params = [{transform_indices = @transform_0, window_bounds = array<i64: 4, 256>}, {pipeline_mode = #tpu.pipeline_mode<synchronous>, transform_indices = @transform_1, window_bounds = array<i64: 9, 256>}, {pipeline_mode = #tpu.pipeline_mode<synchronous>, transform_indices = @transform_2, window_bounds = array<i64: 3, 256>}, {transform_indices = @transform_3, window_bounds = array<i64: 4, 256>}]} {
    %c0 = arith.constant 0 : index
    %c0_0 = arith.constant 0 : index
    %0 = vector.load %arg1[%c0, %c0_0] : memref<4x256xf32, #tpu.memory_space<vmem>>, vector<4x256xf32>
    %c255_i32 = arith.constant 255 : i32
    %1 = tpu.dynamic_rotate %0 by %c255_i32 dim 1 : vector<4x256xf32>, i32 -> vector<4x256xf32>
    %c254_i32 = arith.constant 254 : i32
    %2 = tpu.dynamic_rotate %0 by %c254_i32 dim 1 : vector<4x256xf32>, i32 -> vector<4x256xf32>
    %c0_1 = arith.constant 0 : index
    %c0_2 = arith.constant 0 : index
    %3 = vector.load %arg2[%c0_1, %c0_2] : memref<9x256xf32, #tpu.memory_space<vmem>>, vector<1x256xf32>
    %4 = vector.broadcast %3 : vector<1x256xf32> to vector<4x256xf32>
    %5 = arith.mulf %0, %4 : vector<4x256xf32>
    %c1 = arith.constant 1 : index
    %c0_3 = arith.constant 0 : index
    %6 = vector.load %arg2[%c1, %c0_3] : memref<9x256xf32, #tpu.memory_space<vmem>>, vector<1x256xf32>
    %7 = vector.broadcast %6 : vector<1x256xf32> to vector<4x256xf32>
    %8 = arith.mulf %1, %7 : vector<4x256xf32>
    %9 = arith.addf %5, %8 : vector<4x256xf32>
    %c2 = arith.constant 2 : index
    %c0_4 = arith.constant 0 : index
    %10 = vector.load %arg2[%c2, %c0_4] : memref<9x256xf32, #tpu.memory_space<vmem>>, vector<1x256xf32>
    %11 = vector.broadcast %10 : vector<1x256xf32> to vector<4x256xf32>
    %12 = arith.mulf %2, %11 : vector<4x256xf32>
    %13 = arith.addf %9, %12 : vector<4x256xf32>
    %c3 = arith.constant 3 : index
    %c0_5 = arith.constant 0 : index
    %14 = vector.load %arg2[%c3, %c0_5] : memref<9x256xf32, #tpu.memory_space<vmem>>, vector<1x256xf32>
    %15 = vector.broadcast %14 : vector<1x256xf32> to vector<4x256xf32>
    %16 = arith.mulf %0, %15 : vector<4x256xf32>
    %c4 = arith.constant 4 : index
    %c0_6 = arith.constant 0 : index
    %17 = vector.load %arg2[%c4, %c0_6] : memref<9x256xf32, #tpu.memory_space<vmem>>, vector<1x256xf32>
    %18 = vector.broadcast %17 : vector<1x256xf32> to vector<4x256xf32>
    %19 = arith.mulf %1, %18 : vector<4x256xf32>
    %20 = arith.addf %16, %19 : vector<4x256xf32>
    %c5 = arith.constant 5 : index
    %c0_7 = arith.constant 0 : index
    %21 = vector.load %arg2[%c5, %c0_7] : memref<9x256xf32, #tpu.memory_space<vmem>>, vector<1x256xf32>
    %22 = vector.broadcast %21 : vector<1x256xf32> to vector<4x256xf32>
    %23 = arith.mulf %2, %22 : vector<4x256xf32>
    %24 = arith.addf %20, %23 : vector<4x256xf32>
    %c240_i32 = arith.constant 240 : i32
    %25 = tpu.dynamic_rotate %24 by %c240_i32 dim 1 : vector<4x256xf32>, i32 -> vector<4x256xf32>
    %c1_8 = arith.constant 1 : index
    %c0_9 = arith.constant 0 : index
    %26 = vector.load %arg3[%c1_8, %c0_9] : memref<3x256xf32, #tpu.memory_space<vmem>>, vector<1x256xf32>
    %27 = vector.broadcast %26 : vector<1x256xf32> to vector<4x256xf32>
    %28 = arith.mulf %25, %27 : vector<4x256xf32>
    %29 = arith.addf %13, %28 : vector<4x256xf32>
    %c6 = arith.constant 6 : index
    %c0_10 = arith.constant 0 : index
    %30 = vector.load %arg2[%c6, %c0_10] : memref<9x256xf32, #tpu.memory_space<vmem>>, vector<1x256xf32>
    %31 = vector.broadcast %30 : vector<1x256xf32> to vector<4x256xf32>
    %32 = arith.mulf %0, %31 : vector<4x256xf32>
    %c7 = arith.constant 7 : index
    %c0_11 = arith.constant 0 : index
    %33 = vector.load %arg2[%c7, %c0_11] : memref<9x256xf32, #tpu.memory_space<vmem>>, vector<1x256xf32>
    %34 = vector.broadcast %33 : vector<1x256xf32> to vector<4x256xf32>
    %35 = arith.mulf %1, %34 : vector<4x256xf32>
    %36 = arith.addf %32, %35 : vector<4x256xf32>
    %c8 = arith.constant 8 : index
    %c0_12 = arith.constant 0 : index
    %37 = vector.load %arg2[%c8, %c0_12] : memref<9x256xf32, #tpu.memory_space<vmem>>, vector<1x256xf32>
    %38 = vector.broadcast %37 : vector<1x256xf32> to vector<4x256xf32>
    %39 = arith.mulf %2, %38 : vector<4x256xf32>
    %40 = arith.addf %36, %39 : vector<4x256xf32>
    %c224_i32 = arith.constant 224 : i32
    %41 = tpu.dynamic_rotate %40 by %c224_i32 dim 1 : vector<4x256xf32>, i32 -> vector<4x256xf32>
    %c2_13 = arith.constant 2 : index
    %c0_14 = arith.constant 0 : index
    %42 = vector.load %arg3[%c2_13, %c0_14] : memref<3x256xf32, #tpu.memory_space<vmem>>, vector<1x256xf32>
    %43 = vector.broadcast %42 : vector<1x256xf32> to vector<4x256xf32>
    %44 = arith.mulf %41, %43 : vector<4x256xf32>
    %45 = arith.addf %29, %44 : vector<4x256xf32>
    %c0_15 = arith.constant 0 : index
    %c0_16 = arith.constant 0 : index
    %46 = vector.load %arg4[%c0_15, %c0_16] : memref<4x256xf32, #tpu.memory_space<vmem>>, vector<4x256xf32>
    tpu.vector_store %arg4[%c0_15, %c0_16], %45 {strides = array<i32>} : memref<4x256xf32, #tpu.memory_space<vmem>>, vector<4x256xf32>,
    return
  }
  func.func @transform_0(%arg0: i32) -> (i32, i32) {
    %c0_i32 = arith.constant 0 : i32
    %c0_i32_0 = arith.constant 0 : i32
    return %arg0, %c0_i32 : i32, i32
  }
  func.func @transform_1(%arg0: i32) -> (i32, i32) {
    %c0_i32 = arith.constant 0 : i32
    %c0_i32_0 = arith.constant 0 : i32
    %c0_i32_1 = arith.constant 0 : i32
    return %c0_i32, %c0_i32_0 : i32, i32
  }
  func.func @transform_2(%arg0: i32) -> (i32, i32) {
    %c0_i32 = arith.constant 0 : i32
    %c0_i32_0 = arith.constant 0 : i32
    %c0_i32_1 = arith.constant 0 : i32
    return %c0_i32, %c0_i32_0 : i32, i32
  }
  func.func @transform_3(%arg0: i32) -> (i32, i32) {
    %c0_i32 = arith.constant 0 : i32
    %c0_i32_0 = arith.constant 0 : i32
    return %arg0, %c0_i32 : i32, i32
  }
}

</mosaic_0001>

<bundles_post_ra>
// kernel: tpu_custom_call.1
= control target key start
LH: loop header
LB: loop body
LE: loop exit
PB: predicated region body
PF: predicated region fallthrough
CT: control target
= control target key end

     0   :  { %8 = vsyncpa [#allocation3], 0  ;;  %s460_s0 = inlined_call_operand.hbm [shape: f32[4,256], index: 0, kind: input, shape index: {}]   ;;  %s461_s1 = inlined_call_operand.hbm [shape: f32[9,256], index: 1, kind: input, shape index: {}]   ;;  %s462_s2 = inlined_call_operand.hbm [shape: f32[3,256], index: 2, kind: input, shape index: {}]   ;;  %s463_s3 = inlined_call_operand.hbm [shape: f32[4,256], index: 3, kind: output, shape index: {}]  }
   0x1   :  { %9 = vsyncpa [#allocation6], 0  ;;  %s26_s14 = sshll.u32 %s461_s1, 4  ;;  %s27_s14 = int_to_ptr.hbm [resolvable:$true] %s26_s14 }
   0x2   :  { %10 = vsyncpa [#allocation4], 0  ;;  %s390_s15 = smov [#allocation5]   ;;  %s16_s19 = sshll.u32 %s460_s0, 4  ;;  %s17_s19 = int_to_ptr.hbm [resolvable:$true] %s16_s19 }
   0x3   :  { %s28_s16 = sshll.u32 %s390_s15, 4  ;;  %s391_s20 = smov 256   ;;  %s29_s16 = int_to_ptr.vmem [resolvable:$true] %s28_s16 }
   0x4   :  { %s392_s21 = smov 16   ;;  %s393_s22 = smov [#allocation2]  }
   0x5   :  { %34 = dma.hbm_to_vmem [thread:$0]  %s27_s14, 512, %s29_s16, [#allocation6], %s391_s20, %s391_s20, %s392_s21  }
   0x6   :  { %s18_s23 = sshll.u32 %s393_s22, 4  ;;  %s40_s26 = sshll.u32 %s462_s2, 4  ;;  %s19_s23 = int_to_ptr.vmem [resolvable:$true] %s18_s23  ;;  %s41_s26 = int_to_ptr.hbm [resolvable:$true] %s40_s26 }
   0x7   :  { %21 = dma.hbm_to_vmem [thread:$0]  %s17_s19, 128, %s19_s23, [#allocation3]  }
   0x8   :  { %s394_s1 = smov [#allocation7]  }
   0x9   :  { %s42_s27 = sshll.u32 %s394_s1, 4  ;;  %s43_s27 = int_to_ptr.vmem [resolvable:$true] %s42_s27 }
   0xa   :  { %45 = dma.hbm_to_vmem [thread:$0]  %s41_s26, 128, %s43_s27, [#allocation6]  }
   0xb   :  { %384 = dma.done.wait [#allocation3], 128  }
   0xc   :  { %385 = vsyncadd [#allocation3], 4294967168 }
   0xd   :  { %386 = dma.done.wait [#allocation6], 640  }
   0xe   :  { %387 = vsyncadd [#allocation6], 4294966656  ;;  %v429_v0 = vld [vmem:[#allocation2] sm:$0xff]  ;;  %s395_s0 = smov 127   ;;  %s396_s2 = smov 126   ;;  %v69_v5 = vlaneseq  ;;  %vm91_vm1 = vcmask 1043456  }
   0xf   :  { %60 = vst [vmem:[#allocation1] ss:$2 sm:$0xff] %v429_v0  ;;  %v86_v7 = vld [vmem:[#allocation5] ss:$8 sm:$0x3]  ;;  %s397_s28 = smov 112  }
  0x10   :  { %v433_v8 = vand.u32 127, %v69_v5  ;;  %v126_v9 = vld [vmem:[#allocation5 + $0x3] ss:$8 sm:$0x3]  ;;  %v89_v12 = vperm.slane %v86_v7, 1  ;;  %v88_v16 = vperm.slane %v86_v7, 0 }
  0x11   :  { %v96_v10 = vld [vmem:[#allocation5 + $0x1] ss:$8 sm:$0x3]  ;;  %v135_v11 = vld [vmem:[#allocation5 + $0x4] ss:$8 sm:$0x3] }
  0x12   :  { %v129_v13 = vperm.slane %v126_v9, 1  ;;  %vm71_vm0 = vcmp.lt.s32.totalorder %v433_v8, 127  ;;  %v99_v14 = vperm.slane %v96_v10, 1  ;;  %v138_v15 = vperm.slane %v135_v11, 1  ;;  %s398_s29 = smov 96   ;;  %s399_s30 = smov [#allocation8]  }
  0x13   :  { %v90_v17 = vrot.slane %v89_v12, 4  ;;  %v98_v18 = vperm.slane %v96_v10, 0  ;;  %v128_v21 = vperm.slane %v126_v9, 0  ;;  %v193_v25 = vld [vmem:[#allocation5 + $0x6] ss:$8 sm:$0x3] }
  0x14   :  { %v130_v22 = vrot.slane %v129_v13, 4  ;;  %v202_v26 = vld [vmem:[#allocation5 + $0x7] ss:$8 sm:$0x3]  ;;  %v137_v32 = vperm.slane %v135_v11, 0  ;;  %v196_v36 = vperm.slane %v193_v25, 1 }
  0x15   :  { %v111_v29 = vld [vmem:[#allocation5 + $0x2] ss:$8 sm:$0x3]  ;;  %v150_v30 = vld [vmem:[#allocation5 + $0x5] ss:$8 sm:$0x3]  ;;  %v92_v31 = vsel %vm91_vm1, %v88_v16, %v90_v17 }
  0x16   :  { %v61_v1 = vld.sshfl [vmem:[#allocation1] sm:$0xff pattern:$0x75316420]  ;;  %v62_v2 = vld.sshfl [vmem:[#allocation1 + $0x8] sm:$0xff pattern:$0x75316420]  ;;  %v131_v35 = vsel %vm91_vm1, %v128_v21, %v130_v22  ;;  %v94_v45 = vmul.f32 %v92_v31, %v429_v0 }
  0x17   :  { %65 = vrot.lane.b32.xlu0 %v61_v1, %s395_s0  ;;  %74 = vst [vmem:[#allocation1] ss:$2 sm:$0xff] %v429_v0  ;;  %v205_v37 = vperm.slane %v202_v26, 1  ;;  %vm83_vm2 = vcmp.lt.s32.totalorder %v433_v8, 126  ;;  %v114_v41 = vperm.slane %v111_v29, 1  ;;  %v153_v42 = vperm.slane %v150_v30, 1 }
  0x18   :  { %v217_v38 = vld [vmem:[#allocation5 + $0x10] ss:$8 sm:$0x3]  ;;  %v195_v43 = vperm.slane %v193_v25, 0  ;;  %v113_v44 = vperm.slane %v111_v29, 0  ;;  %v152_v47 = vperm.slane %v150_v30, 0  ;;  %v133_v50 = vmul.f32 %v131_v35, %v429_v0 }
  0x19   :  { %v220_v48 = vperm.slane %v217_v38, 1  ;;  %v197_v51 = vrot.slane %v196_v36, 4  ;;  %v204_v58 = vperm.slane %v202_v26, 0  ;;  %v219_v5 = vperm.slane %v217_v38, 0  ;;  %s265_s4 = sshll.u32 %s399_s30, 4  ;;  %s267_s7 = sshll.u32 %s463_s3, 4  ;;  %s266_s4 = int_to_ptr.vmem [resolvable:$true] %s265_s4  ;;  %s268_s7 = int_to_ptr.hbm [resolvable:$true] %s267_s7 }
  0x1a   :  { %vm174_vm3 = vcmp.lt.s32.totalorder %v433_v8, 112  ;;  %vm241_vm4 = vcmp.lt.s32.totalorder %v433_v8, 96 }
  0x1b   :  { %v198_v1 = vsel %vm91_vm1, %v195_v43, %v197_v51 }
  0x1c   :  { %v200_v13 = vmul.f32 %v198_v1, %v429_v0 }
  0x1e   :  { %v75_v3 = vld.sshfl [vmem:[#allocation1] sm:$0xff pattern:$0x75316420]  ;;  %v76_v4 = vld.sshfl [vmem:[#allocation1 + $0x8] sm:$0xff pattern:$0x75316420] }
  0x1f   :  { %67 = vrot.lane.b32.xlu0 %v62_v2, %s395_s0  ;;  %79 = vrot.lane.b32.xlu1 %v75_v3, %s396_s2 }
  0x27   :  { %81 = vrot.lane.b32.xlu1 %v76_v4, %s396_s2 }
  0x89   :  { %v66_v6 = vpop.permute.xlu0 %65 }
  0x91   :  { %v68_v19 = vpop.permute.xlu0 %67  ;;  %v80_v20 = vpop.permute.xlu1 %79 }
  0x92   :  { %v72_v23 = vsel %vm71_vm0, %v66_v6, %v68_v19  ;;  %v73_v24 = vsel %vm71_vm0, %v68_v19, %v66_v6 }
  0x93   :  { %v103_v27 = vmul.f32 %v99_v14, %v73_v24  ;;  %v142_v28 = vmul.f32 %v138_v15, %v73_v24  ;;  %v102_v33 = vmul.f32 %v98_v18, %v72_v23  ;;  %v141_v46 = vmul.f32 %v137_v32, %v72_v23 }
  0x94   :  { %v209_v55 = vmul.f32 %v205_v37, %v73_v24  ;;  %v208_v11 = vmul.f32 %v204_v58, %v72_v23  ;;  %v178_v23 = vld [vmem:[#allocation7 + $0x1] ss:$4 sm:$0x3] }
  0x95   :  { %v106_v34 = vrot.slane %v103_v27, 4  ;;  %v145_v40 = vrot.slane %v142_v28, 4  ;;  %v181_v25 = vperm.slane %v178_v23, 1  ;;  %v245_v28 = vld [vmem:[#allocation7 + $0x2] ss:$4 sm:$0x3] }
  0x96   :  { %v212_v4 = vrot.slane %v209_v55, 4  ;;  %v180_v29 = vperm.slane %v178_v23, 0  ;;  %v248_v32 = vperm.slane %v245_v28, 1  ;;  %v247_v35 = vperm.slane %v245_v28, 0 }
  0x97   :  { %v107_v39 = vsel %vm91_vm1, %v102_v33, %v106_v34  ;;  %v146_v54 = vsel %vm91_vm1, %v141_v46, %v145_v40 }
  0x98   :  { %v109_v2 = vadd.f32 %v107_v39, %v94_v45  ;;  %v148_v3 = vadd.f32 %v146_v54, %v133_v50  ;;  %v213_v14 = vsel %vm91_vm1, %v208_v11, %v212_v4 }
  0x99   :  { %v82_v49 = vpop.permute.xlu1 %81  ;;  %v215_v17 = vadd.f32 %v213_v14, %v200_v13 }
  0x9a   :  { %v84_v52 = vsel %vm83_vm2, %v80_v20, %v82_v49  ;;  %v85_v53 = vsel %vm83_vm2, %v82_v49, %v80_v20 }
  0x9b   :  { %v118_v56 = vmul.f32 %v114_v41, %v85_v53  ;;  %v157_v57 = vmul.f32 %v153_v42, %v85_v53  ;;  %v117_v59 = vmul.f32 %v113_v44, %v84_v52  ;;  %v156_v61 = vmul.f32 %v152_v47, %v84_v52 }
  0x9c   :  { %v224_v63 = vmul.f32 %v220_v48, %v85_v53  ;;  %v223_v15 = vmul.f32 %v219_v5, %v84_v52 }
  0x9d   :  { %v121_v60 = vrot.slane %v118_v56, 4  ;;  %v160_v62 = vrot.slane %v157_v57, 4 }
  0x9e   :  { %v227_v12 = vrot.slane %v224_v63, 4 }
  0x9f   :  { %v122_v6 = vsel %vm91_vm1, %v117_v59, %v121_v60  ;;  %v161_v7 = vsel %vm91_vm1, %v156_v61, %v160_v62 }
  0xa0   :  { %v163_v9 = vadd.f32 %v161_v7, %v148_v3  ;;  %v124_v10 = vadd.f32 %v122_v6, %v109_v2  ;;  %v228_v16 = vsel %vm91_vm1, %v223_v15, %v227_v12 }
  0xa1   :  { %v230_v18 = vadd.f32 %v228_v16, %v215_v17 }
  0xa2   :  { %165 = vst [vmem:[#allocation1] ss:$2 sm:$0xff] %v163_v9 }
  0xa9   :  { %v166_v19 = vld.sshfl [vmem:[#allocation1] sm:$0xff pattern:$0x75316420]  ;;  %v167_v20 = vld.sshfl [vmem:[#allocation1 + $0x8] sm:$0xff pattern:$0x75316420] }
  0xaa   :  { %170 = vrot.lane.b32.xlu2 %v166_v19, %s397_s28  ;;  %232 = vst [vmem:[#allocation1] ss:$2 sm:$0xff] %v230_v18 }
  0xb1   :  { %v234_v21 = vld.sshfl [vmem:[#allocation1 + $0x8] sm:$0xff pattern:$0x75316420]  ;;  %v233_v22 = vld.sshfl [vmem:[#allocation1] sm:$0xff pattern:$0x75316420] }
  0xb2   :  { %172 = vrot.lane.b32.xlu2 %v167_v20, %s397_s28  ;;  %239 = vrot.lane.b32.xlu1 %v234_v21, %s398_s29 }
  0xb3   :  { %237 = vrot.lane.b32.xlu0 %v233_v22, %s398_s29 }
 0x104   :  { %v171_v0 = vpop.permute.xlu2 %170 }
 0x10c   :  { %v173_v24 = vpop.permute.xlu2 %172 }
 0x10d   :  { %v176_v26 = vsel %vm174_vm3, %v173_v24, %v171_v0  ;;  %v175_v30 = vsel %vm174_vm3, %v171_v0, %v173_v24 }
 0x10e   :  { %v185_v27 = vmul.f32 %v181_v25, %v176_v26  ;;  %v184_v34 = vmul.f32 %v180_v29, %v175_v30 }
 0x110   :  { %v188_v31 = vrot.slane %v185_v27, 4 }
 0x112   :  { %v189_v39 = vsel %vm91_vm1, %v184_v34, %v188_v31 }
 0x113   :  { %v191_v43 = vadd.f32 %v189_v39, %v124_v10 }
 0x124   :  { %v240_v33 = vpop.permute.xlu1 %239 }
 0x125   :  { %v238_v36 = vpop.permute.xlu0 %237 }
 0x126   :  { %v242_v37 = vsel %vm241_vm4, %v238_v36, %v240_v33  ;;  %v243_v38 = vsel %vm241_vm4, %v240_v33, %v238_v36 }
 0x127   :  { %v252_v40 = vmul.f32 %v248_v32, %v243_v38  ;;  %v251_v41 = vmul.f32 %v247_v35, %v242_v37 }
 0x129   :  { %v255_v42 = vrot.slane %v252_v40, 4 }
 0x12b   :  { %v256_v8 = vsel %vm91_vm1, %v251_v41, %v255_v42 }
 0x12c   :  { %v258_v44 = vadd.f32 %v256_v8, %v191_v43 }
 0x12e   :  { %259 = vst [vmem:[#allocation8] sm:$0xff] %v258_v44 }
 0x12f   :  { %270 = dma.vmem_to_hbm [thread:$0]  %s266_s4, 128, %s268_s7, [#allocation4]  }
 0x130   :  { %388 = dma.done.wait [#allocation4], 128  }
 0x131   :  { %389 = vsyncadd [#allocation4], 4294967168 }
 0x132   :  { %275 = vsyncpa [#allocation3], 1 }
 0x133   :  { %276 = vsyncpa [#allocation6], 1 }
 0x134   :  { %277 = vsyncpa [#allocation4], 1 }

</bundles_post_ra>
